<compile_context>
chip_gen: v7x
topology: tpu7x:2x2x1
jax: 0.10.0
libtpu: 0.0.40
codegen_flags: <defaults>
</compile_context>

<pallas_src>
import functools

import jax
import jax.numpy as jnp
from jax.experimental import pallas as pl
from jax.experimental.pallas import tpu as pltpu

_LANES = 128
_FUSED_PAYLOAD_LIMIT = 24 * 1024 * 1024   # x + a + out payload cap for the fused path
_FUSED_VMEM_LIMIT = 32 * 1024 * 1024      # explicit scoped-VMEM limit (safe on v5e/v6e/v7x)


# ----------------------------------------------------------------------------
# Fused kernel: whole signals VMEM-resident, energies + scale + mix in one pass.
# ----------------------------------------------------------------------------
def _fused_kernel(s_ref, x_ref, a_ref, o_ref):
    x = x_ref[...]
    a = a_ref[...]
    ts = jnp.sum(x * x)          # tensor_squared
    asq = jnp.sum(a * a)         # audio_squared
    safe_asq = jnp.where(asq == 0.0, 1.0, asq)
    scale = jnp.sqrt(s_ref[0] * ts / safe_asq)   # s_ref[0] = 10^(-snr/10), precomputed
    # torch branches: ts == 0 -> return audio; asq == 0 -> return tensor.
    alpha = jnp.where(ts == 0.0, 0.0, 1.0)
    beta = jnp.where(ts == 0.0, 1.0, jnp.where(asq == 0.0, 0.0, scale))
    o_ref[...] = alpha * x + beta * a


def _fused(x2d, a2d, snr_pow):
    R, L = x2d.shape
    return pl.pallas_call(
        _fused_kernel,
        out_shape=jax.ShapeDtypeStruct((R, L), jnp.float32),
        in_specs=[
            pl.BlockSpec(memory_space=pltpu.MemorySpace.SMEM),   # 10^(-snr/10)
            pl.BlockSpec(memory_space=pltpu.MemorySpace.VMEM),   # signal slab
            pl.BlockSpec(memory_space=pltpu.MemorySpace.VMEM),   # noise slab
        ],
        out_specs=pl.BlockSpec(memory_space=pltpu.MemorySpace.VMEM),
        compiler_params=pltpu.CompilerParams(vmem_limit_bytes=_FUSED_VMEM_LIMIT),
    )(jnp.reshape(snr_pow, (1,)).astype(jnp.float32), x2d, a2d)


# ----------------------------------------------------------------------------
# Streamed fallback, pass 1: sum of squares of both signals.
# Per-tile work is pure VPU (elementwise mul + add into a VMEM accumulator);
# the single cross-lane reduction + (1,1) store happens only at the last step.
# ----------------------------------------------------------------------------
def _sumsq_kernel(x_ref, a_ref, xs_ref, as_ref, accx_ref, acca_ref):
    i = pl.program_id(0)

    @pl.when(i == 0)
    def _():
        accx_ref[...] = jnp.zeros_like(accx_ref)
        acca_ref[...] = jnp.zeros_like(acca_ref)

    x = x_ref[...]
    a = a_ref[...]
    accx_ref[...] += x * x
    acca_ref[...] += a * a

    @pl.when(i == pl.num_programs(0) - 1)
    def _():
        xs_ref[0, 0] = jnp.sum(accx_ref[...])
        as_ref[0, 0] = jnp.sum(acca_ref[...])


def _sum_squares(x2d, a2d, *, row_tile):
    R, L = x2d.shape
    grid = (R // row_tile,)
    ts, asq = pl.pallas_call(
        _sumsq_kernel,
        out_shape=(
            jax.ShapeDtypeStruct((1, 1), jnp.float32),
            jax.ShapeDtypeStruct((1, 1), jnp.float32),
        ),
        grid_spec=pltpu.PrefetchScalarGridSpec(
            num_scalar_prefetch=0,
            grid=grid,
            in_specs=[
                pl.BlockSpec((row_tile, L), lambda i: (i, 0)),
                pl.BlockSpec((row_tile, L), lambda i: (i, 0)),
            ],
            out_specs=[
                pl.BlockSpec((1, 1), lambda i: (0, 0)),
                pl.BlockSpec((1, 1), lambda i: (0, 0)),
            ],
            scratch_shapes=[
                pltpu.VMEM((row_tile, L), jnp.float32),
                pltpu.VMEM((row_tile, L), jnp.float32),
            ],
        ),
        compiler_params=pltpu.CompilerParams(
            dimension_semantics=("arbitrary",),   # accumulator axis: must stay arbitrary
        ),
    )(x2d, a2d)
    return ts[0, 0], asq[0, 0]


# ----------------------------------------------------------------------------
# Streamed fallback, pass 2: out = alpha * x + beta * a.
# alpha/beta are precomputed scalars (already fold the zero-energy branches and
# the sqrt/pow), passed via SMEM so the per-tile body is a single FMA-shaped op.
# ----------------------------------------------------------------------------
def _mix_kernel(ab_ref, x_ref, a_ref, o_ref):
    alpha = ab_ref[0]
    beta = ab_ref[1]
    o_ref[...] = alpha * x_ref[...] + beta * a_ref[...]


def _mix(x2d, a2d, ab, *, row_tile):
    R, L = x2d.shape
    grid = (R // row_tile,)
    return pl.pallas_call(
        _mix_kernel,
        out_shape=jax.ShapeDtypeStruct((R, L), jnp.float32),
        grid_spec=pltpu.PrefetchScalarGridSpec(
            num_scalar_prefetch=0,
            grid=grid,
            in_specs=[
                pl.BlockSpec(memory_space=pltpu.MemorySpace.SMEM),   # (alpha, beta)
                pl.BlockSpec((row_tile, L), lambda i: (i, 0)),
                pl.BlockSpec((row_tile, L), lambda i: (i, 0)),
            ],
            out_specs=pl.BlockSpec((row_tile, L), lambda i: (i, 0)),
        ),
        compiler_params=pltpu.CompilerParams(
            dimension_semantics=("parallel",),    # embarrassingly parallel (v7x 2-TC)
        ),
    )(ab, x2d, a2d)


# ----------------------------------------------------------------------------
# Shape glue (matches the torch crop / tile length-matching).
# ----------------------------------------------------------------------------
def _match_length(noise, target_len, crop_start=0):
    noise_len = noise.shape[1]
    if target_len < noise_len:
        # torch picks a random crop offset on the host; deterministic here.
        return jax.lax.dynamic_slice_in_dim(noise, crop_start, target_len, axis=1)
    if target_len == noise_len:
        return noise
    reps = target_len // noise_len
    rest = target_len - reps * noise_len
    # torch collapses the tiled noise to 1-D; replicate with channel 0.
    # TODO(synk): multi-channel noise parity in the tiling branch mirrors torch's
    # 1-D collapse (channel 0), which is what the original code effectively does.
    mono = noise[0]
    tiled = jnp.concatenate([jnp.tile(mono, reps), mono[:rest]])
    return tiled[None, :]


def _to_slab(x, row_multiple):
    """Flatten to a lane-dense (rows, 128) f32 slab, zero-padded so rows % row_multiple == 0."""
    flat = x.reshape(-1)
    n = flat.shape[0]
    chunk = _LANES * row_multiple
    n_pad = (-n) % chunk
    flat = jnp.pad(flat, (0, n_pad))
    return flat.reshape(-1, _LANES)


@functools.partial(jax.jit, static_argnames=("row_tile", "force_streamed"))
def esc50_noise_injection(tensor, noise, snr_db, *, row_tile=1024, force_streamed=False):
    """tensor: (C, T) signal; noise: (C_n, T_noise) noise clip; snr_db: scalar (dB)."""
    C, T = tensor.shape
    noise_m = _match_length(noise, T)
    noise_m = jnp.broadcast_to(noise_m, tensor.shape)

    snr_db = jnp.asarray(snr_db, jnp.float32)
    snr_pow = jnp.power(jnp.float32(10.0), -snr_db / 10.0)   # tiny host-side-of-kernel scalar op

    n = C * T
    padded_n_fused = -(-n // (_LANES * 8)) * (_LANES * 8)
    fused_bytes = 3 * padded_n_fused * 4                      # x + a + out payload, f32
    use_fused = (not force_streamed) and (fused_bytes <= _FUSED_PAYLOAD_LIMIT)

    if use_fused:
        x2d = _to_slab(tensor.astype(jnp.float32), 8)
        a2d = _to_slab(noise_m.astype(jnp.float32), 8)
        out2d = _fused(x2d, a2d, snr_pow)
    else:
        x2d = _to_slab(tensor.astype(jnp.float32), row_tile)
        a2d = _to_slab(noise_m.astype(jnp.float32), row_tile)
        ts, asq = _sum_squares(x2d, a2d, row_tile=row_tile)
        scale = jnp.sqrt(snr_pow * ts / jnp.where(asq == 0.0, 1.0, asq))
        alpha = jnp.where(ts == 0.0, 0.0, 1.0)
        beta = jnp.where(ts == 0.0, 1.0, jnp.where(asq == 0.0, 0.0, scale))
        ab = jnp.stack([alpha, beta]).astype(jnp.float32)
        out2d = _mix(x2d, a2d, ab, row_tile=row_tile)

    out = out2d.reshape(-1)[:n].reshape(C, T)
    return out.astype(tensor.dtype)


if __name__ == "__main__":
    key = jax.random.PRNGKey(0)
    k_sig, k_noise, k_snr = jax.random.split(key, 3)

    C, T = 1, 6000           # mono clip; NOT a multiple of 128 -> exercises padding/tail
    NOISE_LEN = 2500         # shorter than T -> exercises the tiling branch

    tensor = jax.random.normal(k_sig, (C, T), dtype=jnp.float32)
    noise = jax.random.normal(k_noise, (C, NOISE_LEN), dtype=jnp.float32)
    # forward's random.uniform(min_snr, max_snr) with defaults [1, 30] dB:
    snr_db = jax.random.uniform(k_snr, (), minval=1.0, maxval=30.0)

    # Fused (primary) path and streamed (fallback) path, both exercised.
    out_fused = esc50_noise_injection(tensor, noise, snr_db)
    out_streamed = esc50_noise_injection(
        tensor, noise, snr_db, row_tile=16, force_streamed=True)
    out_fused, out_streamed = jax.block_until_ready((out_fused, out_streamed))

    # Pure-JAX reference of the hot path.
    noise_full = jnp.broadcast_to(_match_length(noise, T), tensor.shape)
    ts_ref = jnp.sum(tensor ** 2)
    as_ref = jnp.sum(noise_full ** 2)
    ref = tensor + jnp.sqrt(10.0 ** (-snr_db / 10.0) * ts_ref / as_ref) * noise_full

    assert out_fused.shape == tensor.shape and out_fused.dtype == tensor.dtype
    assert out_streamed.shape == tensor.shape and out_streamed.dtype == tensor.dtype
    assert jnp.allclose(out_fused, ref, atol=1e-4, rtol=1e-4)
    assert jnp.allclose(out_streamed, ref, atol=1e-4, rtol=1e-4)

    print("KERNEL_OK")
</pallas_src>

<mosaic_0001>
module attributes {stable_mosaic.version = 11 : i64} {
  func.func @_fused_kernel(%arg0: memref<1xf32, #tpu.memory_space<smem>>, %arg1: memref<48x128xf32, #tpu.memory_space<vmem>>, %arg2: memref<48x128xf32, #tpu.memory_space<vmem>>, %arg3: memref<48x128xf32, #tpu.memory_space<vmem>>) attributes {dimension_semantics = [], scalar_prefetch = 0 : i64, scratch_operands = 0 : i64, tpu.core_type = #tpu.core_type<tc>} {
    %c0 = arith.constant 0 : index
    %c0_0 = arith.constant 0 : index
    %0 = vector.load %arg1[%c0, %c0_0] : memref<48x128xf32, #tpu.memory_space<vmem>>, vector<48x128xf32>
    %c0_1 = arith.constant 0 : index
    %c0_2 = arith.constant 0 : index
    %1 = vector.load %arg2[%c0_1, %c0_2] : memref<48x128xf32, #tpu.memory_space<vmem>>, vector<48x128xf32>
    %2 = arith.mulf %0, %0 : vector<48x128xf32>
    %3 = vector.shape_cast %2 : vector<48x128xf32> to vector<1x48x128xf32>
    %cst = arith.constant dense<0.000000e+00> : vector<1xf32>
    %4 = vector.multi_reduction <add>, %3, %cst [1, 2] : vector<1x48x128xf32> to vector<1xf32>
    %5 = vector.shape_cast %4 : vector<1xf32> to vector<1x1x1xf32>
    %6 = vector.extract %5[0, 0, 0] : f32 from vector<1x1x1xf32>
    %7 = arith.mulf %1, %1 : vector<48x128xf32>
    %8 = vector.shape_cast %7 : vector<48x128xf32> to vector<1x48x128xf32>
    %cst_3 = arith.constant dense<0.000000e+00> : vector<1xf32>
    %9 = vector.multi_reduction <add>, %8, %cst_3 [1, 2] : vector<1x48x128xf32> to vector<1xf32>
    %10 = vector.shape_cast %9 : vector<1xf32> to vector<1x1x1xf32>
    %11 = vector.extract %10[0, 0, 0] : f32 from vector<1x1x1xf32>
    %cst_4 = arith.constant 0.000000e+00 : f32
    %12 = arith.cmpf oeq, %11, %cst_4 : f32
    %cst_5 = arith.constant 1.000000e+00 : f32
    %13 = arith.select %12, %cst_5, %11 : f32
    %c0_6 = arith.constant 0 : index
    %14 = memref.load %arg0[%c0_6] : memref<1xf32, #tpu.memory_space<smem>>
    %15 = arith.mulf %14, %6 : f32
    %16 = arith.divf %15, %13 : f32
    %17 = math.sqrt %16 : f32
    %cst_7 = arith.constant 0.000000e+00 : f32
    %18 = arith.cmpf oeq, %6, %cst_7 : f32
    %cst_8 = arith.constant 0.000000e+00 : f32
    %cst_9 = arith.constant 1.000000e+00 : f32
    %19 = arith.select %18, %cst_8, %cst_9 : f32
    %cst_10 = arith.constant 0.000000e+00 : f32
    %20 = arith.cmpf oeq, %6, %cst_10 : f32
    %cst_11 = arith.constant 0.000000e+00 : f32
    %21 = arith.cmpf oeq, %11, %cst_11 : f32
    %cst_12 = arith.constant 0.000000e+00 : f32
    %22 = arith.select %21, %cst_12, %17 : f32
    %cst_13 = arith.constant 1.000000e+00 : f32
    %23 = arith.select %20, %cst_13, %22 : f32
    %24 = vector.broadcast %19 : f32 to vector<48x128xf32>
    %25 = arith.mulf %24, %0 : vector<48x128xf32>
    %26 = vector.broadcast %23 : f32 to vector<48x128xf32>
    %27 = arith.mulf %26, %1 : vector<48x128xf32>
    %28 = arith.addf %25, %27 : vector<48x128xf32>
    %c0_14 = arith.constant 0 : index
    %c0_15 = arith.constant 0 : index
    %29 = vector.load %arg3[%c0_14, %c0_15] : memref<48x128xf32, #tpu.memory_space<vmem>>, vector<48x128xf32>
    tpu.vector_store %arg3[%c0_14, %c0_15], %28 {strides = array<i32>} : memref<48x128xf32, #tpu.memory_space<vmem>>, vector<48x128xf32>,
    return
  }
}

</mosaic_0001>

<bundles_post_ra>
// kernel: tile.6
= control target key start
LH: loop header
LB: loop body
LE: loop exit
PB: predicated region body
PF: predicated region fallthrough
CT: control target
= control target key end

     0   :  { %s270_s0 = inlined_call_operand.vmem [shape: f32[2500], index: 0, kind: input, shape index: {}]   ;;  %s271_s1 = inlined_call_operand.vmem [shape: f32[2,2500], index: 1, kind: output, shape index: {}]  }
   0x1   :  { %v4_v0 = vld [vmem:[%s270_s0] ss:$0 sm:$0xff]  ;;  %v102_v1 = vld [vmem:[%s270_s0 + $0x1] ss:$0 sm:$0xff]  ;;  %v104_v2 = vld [vmem:[%s270_s0 + $0x2] ss:$0 sm:$0xff] }
   0x2   :  { %5 = vst [vmem:[%s271_s1] sm:$0x3] %v4_v0  ;;  %103 = vst [vmem:[%s271_s1 + $0x2] sm:$0x3] %v102_v1  ;;  %v106_v3 = vld [vmem:[%s270_s0 + $0x3] ss:$0 sm:$0xff] }
   0x3   :  { %105 = vst [vmem:[%s271_s1 + $0x4] sm:$0x3] %v104_v2  ;;  %v108_v4 = vld [vmem:[%s270_s0 + $0x4] ss:$0 sm:$0xff]  ;;  %v110_v5 = vld [vmem:[%s270_s0 + $0x5] ss:$0 sm:$0xff] }
   0x4   :  { %107 = vst [vmem:[%s271_s1 + $0x6] sm:$0x3] %v106_v3  ;;  %109 = vst [vmem:[%s271_s1 + $0x8] sm:$0x3] %v108_v4  ;;  %v112_v6 = vld [vmem:[%s270_s0 + $0x6] ss:$0 sm:$0xff] }
   0x5   :  { %111 = vst [vmem:[%s271_s1 + $0xa] sm:$0x3] %v110_v5  ;;  %v114_v7 = vld [vmem:[%s270_s0 + $0x7] ss:$0 sm:$0xff]  ;;  %v116_v8 = vld [vmem:[%s270_s0 + $0x8] ss:$0 sm:$0xff] }
   0x6   :  { %113 = vst [vmem:[%s271_s1 + $0xc] sm:$0x3] %v112_v6  ;;  %115 = vst [vmem:[%s271_s1 + $0xe] sm:$0x3] %v114_v7  ;;  %v118_v9 = vld [vmem:[%s270_s0 + $0x9] ss:$0 sm:$0xff] }
   0x7   :  { %117 = vst [vmem:[%s271_s1 + $0x10] sm:$0x3] %v116_v8  ;;  %v120_v10 = vld [vmem:[%s270_s0 + $0xa] ss:$0 sm:$0xff]  ;;  %v122_v11 = vld [vmem:[%s270_s0 + $0xb] ss:$0 sm:$0xff] }
   0x8   :  { %119 = vst [vmem:[%s271_s1 + $0x12] sm:$0x3] %v118_v9  ;;  %121 = vst [vmem:[%s271_s1 + $0x14] sm:$0x3] %v120_v10  ;;  %v124_v12 = vld [vmem:[%s270_s0 + $0xc] ss:$0 sm:$0xff] }
   0x9   :  { %123 = vst [vmem:[%s271_s1 + $0x16] sm:$0x3] %v122_v11  ;;  %v126_v13 = vld [vmem:[%s270_s0 + $0xd] ss:$0 sm:$0xff]  ;;  %v128_v14 = vld [vmem:[%s270_s0 + $0xe] ss:$0 sm:$0xff] }
   0xa   :  { %125 = vst [vmem:[%s271_s1 + $0x18] sm:$0x3] %v124_v12  ;;  %127 = vst [vmem:[%s271_s1 + $0x1a] sm:$0x3] %v126_v13  ;;  %v130_v15 = vld [vmem:[%s270_s0 + $0xf] ss:$0 sm:$0xff] }
   0xb   :  { %129 = vst [vmem:[%s271_s1 + $0x1c] sm:$0x3] %v128_v14  ;;  %v132_v16 = vld [vmem:[%s270_s0 + $0x10] ss:$0 sm:$0xff]  ;;  %v134_v17 = vld [vmem:[%s270_s0 + $0x11] ss:$0 sm:$0xff] }
   0xc   :  { %131 = vst [vmem:[%s271_s1 + $0x1e] sm:$0x3] %v130_v15  ;;  %133 = vst [vmem:[%s271_s1 + $0x20] sm:$0x3] %v132_v16  ;;  %v136_v18 = vld [vmem:[%s270_s0 + $0x12] ss:$0 sm:$0xff] }
   0xd   :  { %135 = vst [vmem:[%s271_s1 + $0x22] sm:$0x3] %v134_v17  ;;  %v138_v19 = vld [vmem:[%s270_s0 + $0x13] ss:$0 sm:$0xff]  ;;  %137 = vst [vmem:[%s271_s1 + $0x24] sm:$0x3] %v136_v18 }
   0xe   :  { %139 = vst [vmem:[%s271_s1 + $0x26] sm:$0x3] %v138_v19 }

// kernel: tile.7
= control target key start
LH: loop header
LB: loop body
LE: loop exit
PB: predicated region body
PF: predicated region fallthrough
CT: control target
= control target key end

     0   :  { %vm107_vm0 = vcmask 1047556   ;;  %vm128_vm1 = vcmask 1046532   ;;  %vm132_vm2 = vcmask 1047559   ;;  %vm134_vm3 = vcmask 490496   ;;  %s249_s22 = smov 68   ;;  %s375_s0 = inlined_call_operand.vmem [shape: f32[2,2500], index: 0, kind: input, shape index: {}]   ;;  %s376_s1 = inlined_call_operand.vmem [shape: f32[5000], index: 1, kind: output, shape index: {}]  }
   0x1   :  { %v218_v0 = vld [vmem:[%s375_s0 + $0x24] sm:$0x3]  ;;  %v219_v1 = vld [vmem:[%s375_s0 + $0x22] sm:$0x3]  ;;  %v220_v2 = vld [vmem:[%s375_s0 + $0x20] sm:$0x3] }
   0x2   :  { %13 = vst [vmem:[#allocation0 + $0x90] sm:$0x3] %v218_v0  ;;  %18 = vst [vmem:[#allocation0 + $0x88] sm:$0x3] %v219_v1  ;;  %v221_v3 = vld [vmem:[%s375_s0 + $0x1e] sm:$0x3] }
   0x3   :  { %23 = vst [vmem:[#allocation0 + $0x80] sm:$0x3] %v220_v2  ;;  %v222_v4 = vld [vmem:[%s375_s0 + $0x1c] sm:$0x3]  ;;  %v223_v5 = vld [vmem:[%s375_s0 + $0x1a] sm:$0x3] }
   0x4   :  { %28 = vst [vmem:[#allocation0 + $0x78] sm:$0x3] %v221_v3  ;;  %33 = vst [vmem:[#allocation0 + $0x70] sm:$0x3] %v222_v4  ;;  %v224_v6 = vld [vmem:[%s375_s0 + $0x18] sm:$0x3] }
   0x5   :  { %38 = vst [vmem:[#allocation0 + $0x68] sm:$0x3] %v223_v5  ;;  %v225_v7 = vld [vmem:[%s375_s0 + $0x16] sm:$0x3]  ;;  %v226_v8 = vld [vmem:[%s375_s0 + $0x14] sm:$0x3] }
   0x6   :  { %43 = vst [vmem:[#allocation0 + $0x60] sm:$0x3] %v224_v6  ;;  %48 = vst [vmem:[#allocation0 + $0x58] sm:$0x3] %v225_v7  ;;  %v227_v9 = vld [vmem:[%s375_s0 + $0x12] sm:$0x3] }
   0x7   :  { %53 = vst [vmem:[#allocation0 + $0x50] sm:$0x3] %v226_v8  ;;  %v228_v10 = vld [vmem:[%s375_s0 + $0x10] sm:$0x3]  ;;  %v229_v11 = vld [vmem:[%s375_s0 + $0xe] sm:$0x3] }
   0x8   :  { %58 = vst [vmem:[#allocation0 + $0x48] sm:$0x3] %v227_v9  ;;  %63 = vst [vmem:[#allocation0 + $0x40] sm:$0x3] %v228_v10  ;;  %v230_v12 = vld [vmem:[%s375_s0 + $0xc] sm:$0x3] }
   0x9   :  { %68 = vst [vmem:[#allocation0 + $0x38] sm:$0x3] %v229_v11  ;;  %v231_v13 = vld [vmem:[%s375_s0 + $0xa] sm:$0x3]  ;;  %v232_v14 = vld [vmem:[%s375_s0 + $0x8] sm:$0x3] }
   0xa   :  { %73 = vst [vmem:[#allocation0 + $0x30] sm:$0x3] %v230_v12  ;;  %78 = vst [vmem:[#allocation0 + $0x28] sm:$0x3] %v231_v13  ;;  %v233_v15 = vld [vmem:[%s375_s0 + $0x6] sm:$0x3] }
   0xb   :  { %83 = vst [vmem:[#allocation0 + $0x20] sm:$0x3] %v232_v14  ;;  %v234_v16 = vld [vmem:[%s375_s0 + $0x4] sm:$0x3]  ;;  %v235_v17 = vld [vmem:[%s375_s0 + $0x2] sm:$0x3] }
   0xc   :  { %88 = vst [vmem:[#allocation0 + $0x18] sm:$0x3] %v233_v15  ;;  %93 = vst [vmem:[#allocation0 + $0x10] sm:$0x3] %v234_v16  ;;  %v98_v18 = vld [vmem:[%s375_s0] sm:$0x3] }
   0xd   :  { %97 = vst [vmem:[#allocation0 + $0x8] sm:$0x3] %v235_v17  ;;  %99 = vst [vmem:[#allocation0] sm:$0x3] %v98_v18  ;;  %v217_v19 = vld [vmem:[%s375_s0 + $0x26] sm:$0x3] }
   0xe   :  { %v119_v20 = vld [vmem:[#allocation0 + $0x80] ss:$8 sm:$0x7]   ;;  %8 = vst [vmem:[#allocation0 + $0x98] sm:$0x3] %v217_v19  ;;  %vm102_vm4 = vcmask 556032  }
   0xf   :  { %v149_v21 = vld [vmem:[#allocation0 + $0x61] ss:$8 sm:$0x70]   ;;  %238 = vst [vmem:[%s376_s1 + $0x10] sm:$0x7] %v119_v20   ;;  %vm141_vm5 = vcmask 1048096  }
  0x10   :  { %v113_v22 = vld [vmem:[#allocation0 + $0x40] ss:$8 sm:$0xf0]   ;;  %v147_v23 = vld [vmem:[#allocation0 + $0x61] ss:$8 sm:$0xf]  }
  0x11   :  { %v111_v24 = vld [vmem:[#allocation0 + $0x40] ss:$8 sm:$0xf]   ;;  %v125_v25 = vld [vmem:[#allocation0 + $0x69] ss:$8 sm:$0xf]   ;;  %v151_v28 = vsel %vm128_vm1, %v149_v21, %v147_v23 }
  0x12   :  { %v106_v26 = vld [vmem:[#allocation0] ss:$8 sm:$0xf0]   ;;  %v115_v27 = vsel %vm107_vm0, %v113_v22, %v111_v24  ;;  %v159_v29 = vld [vmem:[#allocation0 + $0x9] ss:$8 sm:$0xf0]  }
  0x13   :  { %237 = vst [vmem:[%s376_s1 + $0x8] sm:$0xff] %v115_v27   ;;  %v181_v32 = vld [vmem:[#allocation0 + $0x49] ss:$8 sm:$0xf]   ;;  %vm138_vm6 = vcmask 64512  }
  0x14   :  { %v157_v30 = vld [vmem:[#allocation0 + $0x9] ss:$8 sm:$0xf]   ;;  %v105_v33 = vld [vmem:[#allocation0] ss:$8 sm:$0xf]  }
  0x15   :  { %v175_v31 = vld [vmem:[#allocation0 + $0x9] ss:$8 sm:$0xf]   ;;  %v161_v35 = vsel %vm107_vm0, %v159_v29, %v157_v30  ;;  %v108_v36 = vsel %vm107_vm0, %v106_v26, %v105_v33  ;;  %v101_v46 = vld [vmem:[#allocation0 + $0x98] sm:$0x1]  }
  0x16   :  { %v153_v34 = vld [vmem:[#allocation0 - $0x6] sm:$0x80]   ;;  %v123_v38 = vld [vmem:[#allocation0 + $0x99] sm:$0x1]   ;;  %109 = vst [vmem:[%s376_s1] sm:$0xff] %v108_v36   ;;  %236 = vst.msk [vmem:[%s376_s1 + $0x13] sm:$0x1] %vm102_vm4, %v101_v46  }
  0x17   :  { %v155_v37 = vsel %vm132_vm2, %v153_v34, %v151_v28  ;;  %v127_v39 = vld [vmem:[#allocation0 + $0x69] ss:$8 sm:$0x70]   ;;  %v131_v42 = vld [vmem:[#allocation0 - $0x6] sm:$0x80]  }
  0x18   :  { %v163_v40 = vsel %vm134_vm3, %v161_v35, %v155_v37  ;;  %v129_v41 = vsel %vm128_vm1, %v127_v39, %v125_v25  ;;  %v177_v43 = vld [vmem:[#allocation0 + $0x9] ss:$8 sm:$0xf0]  }
  0x19   :  { %164 = vrot.lane.b32.xlu0 %v163_v40, %s249_s22  ;;  %v133_v44 = vsel %vm132_vm2, %v131_v42, %v129_v41  ;;  %v179_v45 = vsel %vm107_vm0, %v177_v43, %v175_v31  ;;  %v193_v49 = vld [vmem:[#allocation0 + $0x49] ss:$8 sm:$0x7]  }
  0x1a   :  { %v135_v47 = vsel %vm134_vm3, %v133_v44, %v123_v38  ;;  %v183_v48 = vsel %vm134_vm3, %v181_v32, %v179_v45 }
  0x1b   :  { %136 = vrot.lane.b32.xlu1 %v135_v47, %s249_s22 }
  0x1d   :  { %184 = vrot.lane.b32.xlu0 %v183_v48, %s249_s22 }
  0x1f   :  { %194 = vrot.lane.b32.xlu1 %v193_v49, %s249_s22 }
  0x8b   :  { %v165_v50 = vpop.permute.xlu0 %164  }
  0x8c   :  { %243 = vst.msk [vmem:[%s376_s1 + $0xd] sm:$0x80] %vm102_vm4, %v165_v50  }
  0x8d   :  { %244 = vst.msk [vmem:[%s376_s1 + $0x14] sm:$0xff] %vm141_vm5, %v165_v50   ;;  %v137_v51 = vpop.permute.xlu1 %136  }
  0x8e   :  { %239 = vst.msk [vmem:[%s376_s1 + $0x27] sm:$0x1] %vm138_vm6, %v137_v51  }
  0x8f   :  { %240 = vst.msk [vmem:[%s376_s1 + $0x20] sm:$0x7f] %vm141_vm5, %v137_v51   ;;  %241 = vst.msk [vmem:[%s376_s1 + $0xc] sm:$0x80] %vm141_vm5, %v137_v51   ;;  %v185_v52 = vpop.permute.xlu0 %184  }
  0x90   :  { %242 = vst.msk [vmem:[%s376_s1 + $0x20] sm:$0x7f] %vm102_vm4, %v165_v50   ;;  %245 = vst.msk [vmem:[%s376_s1 + $0x15] sm:$0xff] %vm102_vm4, %v185_v52  }
  0x91   :  { %246 = vst.msk [vmem:[%s376_s1 + $0x1c] sm:$0xf] %vm141_vm5, %v185_v52   ;;  %v195_v53 = vpop.permute.xlu1 %194  }
  0x92   :  { %247 = vst.msk [vmem:[%s376_s1 + $0x1d] sm:$0x7] %vm102_vm4, %v195_v53  }

// kernel: esc50_noise_injection.1
= control target key start
LH: loop header
LB: loop body
LE: loop exit
PB: predicated region body
PF: predicated region fallthrough
CT: control target
= control target key end

     0   :  { %s269_s1 = inlined_call_operand.vmem [shape: f32[48,128], index: 1, kind: input, shape index: {}]   ;;  %s270_s2 = inlined_call_operand.vmem [shape: f32[48,128], index: 2, kind: input, shape index: {}]   ;;  %s271_s0 = inlined_call_operand.<no memory space> [shape: f32[1], index: 0, kind: input, shape index: {}]   ;;  %s272_s3 = inlined_call_operand.vmem [shape: f32[48,128], index: 3, kind: output, shape index: {}]  }
   0x1   :  { %v153_v0 = vld [vmem:[%s269_s1] sm:$0xff]  ;;  %v158_v1 = vld [vmem:[%s269_s1 + $0x8] sm:$0xff]  ;;  %v163_v2 = vld [vmem:[%s269_s1 + $0x10] sm:$0xff] }
   0x2   :  { %v168_v3 = vld [vmem:[%s269_s1 + $0x18] sm:$0xff]  ;;  %v173_v4 = vld [vmem:[%s269_s1 + $0x20] sm:$0xff]  ;;  %v27_v5 = vmul.f32 %v153_v0, %v153_v0  ;;  %v28_v6 = vmul.f32 %v158_v1, %v158_v1  ;;  %v29_v7 = vmul.f32 %v163_v2, %v163_v2  ;;  %v191_v10 = vld [vmem:[%s270_s2 + $0x8] sm:$0xff] }
   0x3   :  { %v30_v8 = vmul.f32 %v168_v3, %v168_v3  ;;  %v186_v9 = vld [vmem:[%s270_s2] sm:$0xff]  ;;  %v196_v11 = vld [vmem:[%s270_s2 + $0x10] sm:$0xff]  ;;  %v201_v13 = vld [vmem:[%s270_s2 + $0x18] sm:$0xff]  ;;  %v48_v15 = vmul.f32 %v191_v10, %v191_v10  ;;  %v31_v19 = vmul.f32 %v173_v4, %v173_v4 }
   0x4   :  { %v33_v12 = vadd.f32 %v28_v6, %v27_v5  ;;  %v47_v14 = vmul.f32 %v186_v9, %v186_v9  ;;  %v49_v16 = vmul.f32 %v196_v11, %v196_v11  ;;  %v212_v17 = vld [vmem:[%s269_s1 + $0x28] sm:$0xff]  ;;  %v217_v18 = vld [vmem:[%s270_s2 + $0x20] sm:$0xff]  ;;  %v50_v21 = vmul.f32 %v201_v13, %v201_v13 }
   0x5   :  { %v226_v23 = vld [vmem:[%s270_s2 + $0x28] sm:$0xff]  ;;  %v32_v24 = vmul.f32 %v212_v17, %v212_v17  ;;  %v51_v26 = vmul.f32 %v217_v18, %v217_v18 }
   0x6   :  { %v34_v20 = vadd.f32 %v33_v12, %v29_v7  ;;  %v53_v22 = vadd.f32 %v48_v15, %v47_v14  ;;  %v52_v29 = vmul.f32 %v226_v23, %v226_v23 }
   0x8   :  { %v35_v25 = vadd.f32 %v34_v20, %v30_v8  ;;  %v54_v27 = vadd.f32 %v53_v22, %v49_v16 }
   0xa   :  { %v36_v28 = vadd.f32 %v35_v25, %v31_v19  ;;  %v55_v30 = vadd.f32 %v54_v27, %v50_v21 }
   0xc   :  { %v37_v31 = vadd.f32 %v36_v28, %v32_v24  ;;  %v56_v32 = vadd.f32 %v55_v30, %v51_v26 }
   0xe   :  { %38 = vadd.xlane.f32.xlu0 %v37_v31  ;;  %v57_v33 = vadd.f32 %v56_v32, %v52_v29 }
  0x12   :  { %58 = vadd.xlane.f32.xlu0 %v57_v33 }
  0x9b   :  { %v39_v34 = vpop.xlane.xlu0 %38 }
  0x9c   :  { %v40_v35 = vrot.slane %v39_v34, 4 }
  0x9e   :  { %v41_v36 = vadd.f32 %v40_v35, %v39_v34 }
  0x9f   :  { %v59_v37 = vpop.xlane.xlu0 %58 }
  0xa0   :  { %v42_v38 = vrot.slane %v41_v36, 2  ;;  %v60_v39 = vrot.slane %v59_v37, 4 }
  0xa2   :  { %v61_v40 = vadd.f32 %v60_v39, %v59_v37  ;;  %v43_v41 = vadd.f32 %v42_v38, %v41_v36 }
  0xa4   :  { %v62_v42 = vrot.slane %v61_v40, 2  ;;  %v44_v43 = vrot.slane %v43_v41, 1 }
  0xa6   :  { %v63_v44 = vadd.f32 %v62_v42, %v61_v40  ;;  %v45_v45 = vadd.f32 %v44_v43, %v43_v41 }
  0xa8   :  { %118 = vpush %v45_v45  ;;  %v64_v46 = vrot.slane %v63_v44, 1 }
  0xaa   :  { %v65_v47 = vadd.f32 %v64_v46, %v63_v44 }
  0xac   :  { %120 = vpush %v65_v47 }
  0xd9   :  { %s119_s1 = spop %118 }
  0xda   :  { %s70_s12 = smul.f32 %s119_s1, %s271_s0  ;;  %p84_p1 = scmp.eq.f32.partialorder %s119_s1, 0.0 }
  0xdc   :  { %s85_s15 = scalar_select %p84_p1, 0.0, 1.0 }
  0xdd   :  { %s121_s2 = spop %120 }
  0xde   :  { %p67_p0 = scmp.eq.f32.partialorder %s121_s2, 0.0  ;;  %v88_v56 = vstv %s85_s15 }
  0xdf   :  { %v89_v57 = vmul.f32 %v88_v56, %v153_v0  ;;  %v90_v58 = vmul.f32 %v88_v56, %v158_v1  ;;  %v91_v59 = vmul.f32 %v88_v56, %v163_v2  ;;  %v92_v60 = vmul.f32 %v88_v56, %v168_v3 }
  0xe0   :  { %s68_s9 = scalar_select %p67_p0, 1.0, %s121_s2  ;;  %v93_v7 = vmul.f32 %v88_v56, %v173_v4  ;;  %v94_v8 = vmul.f32 %v88_v56, %v212_v17 }
  0xe2   :  { %v71_v48 = vstv %s68_s9 }
  0xe3   :  { %126 = vrcp.f32 %v71_v48 }
  0xed   :  { %v127_v49 = vpop.eup %126 }
  0xee   :  { %122 = vpush %v127_v49 }
 0x11f   :  { %s123_s13 = spop %122 }
 0x120   :  { %s74_s14 = smul.f32 %s123_s13, %s70_s12 }
 0x122   :  { %v75_v50 = vstv %s74_s14 }
 0x123   :  { %128 = vrsqrt.f32 %v75_v50  ;;  %vm78_vm0 = vcmp.eq.f32.partialorder %v75_v50, inf  ;;  %v81_v53 = vand.u32 2147483648, %v75_v50  ;;  %vm80_vm1 = vcmp.eq.f32.partialorder %v75_v50, 0.0 }
 0x12d   :  { %v129_v51 = vpop.eup %128 }
 0x12e   :  { %v77_v52 = vmul.f32 %v129_v51, %v75_v50 }
 0x130   :  { %v79_v54 = vsel %vm78_vm0, %v75_v50, %v77_v52 }
 0x131   :  { %v82_v55 = vsel %vm80_vm1, %v81_v53, %v79_v54 }
 0x132   :  { %124 = vpush %v82_v55 }
 0x163   :  { %s125_s16 = spop %124 }
 0x164   :  { %s274_s16 = smov (%p67_p0, %s125_s16), 0.0 }
 0x165   :  { %s276_s16 = smov (%p84_p1, %s274_s16), 1.0 }
 0x166   :  { %v95_v61 = vstv %s276_s16 }
 0x167   :  { %v96_v62 = vmul.f32 %v95_v61, %v186_v9  ;;  %v97_v63 = vmul.f32 %v95_v61, %v191_v10  ;;  %v98_v5 = vmul.f32 %v95_v61, %v196_v11  ;;  %v99_v6 = vmul.f32 %v95_v61, %v201_v13 }
 0x168   :  { %v100_v0 = vmul.f32 %v95_v61, %v217_v18  ;;  %v101_v1 = vmul.f32 %v95_v61, %v226_v23 }
 0x169   :  { %v102_v2 = vadd.f32 %v96_v62, %v89_v57  ;;  %v103_v12 = vadd.f32 %v97_v63, %v90_v58  ;;  %v104_v3 = vadd.f32 %v98_v5, %v91_v59  ;;  %v105_v14 = vadd.f32 %v99_v6, %v92_v60 }
 0x16a   :  { %v106_v15 = vadd.f32 %v100_v0, %v93_v7  ;;  %v107_v9 = vadd.f32 %v101_v1, %v94_v8 }
 0x16b   :  { %108 = vst [vmem:[%s272_s3] sm:$0xff] %v102_v2  ;;  %109 = vst [vmem:[%s272_s3 + $0x8] sm:$0xff] %v103_v12 }
 0x16c   :  { %110 = vst [vmem:[%s272_s3 + $0x10] sm:$0xff] %v104_v3  ;;  %111 = vst [vmem:[%s272_s3 + $0x18] sm:$0xff] %v105_v14 }
 0x16d   :  { %112 = vst [vmem:[%s272_s3 + $0x20] sm:$0xff] %v106_v15  ;;  %113 = vst [vmem:[%s272_s3 + $0x28] sm:$0xff] %v107_v9 }

</bundles_post_ra>
